<compile_context>
chip_gen: v7x
topology: tpu7x:2x2x1
jax: 0.10.0
libtpu: 0.0.40
codegen_flags: <defaults>
</compile_context>

<pallas_src>
import functools
import math

import jax
import jax.numpy as jnp
from jax.experimental import pallas as pl
from jax.experimental.pallas import tpu as pltpu


# ---------------------------------------------------------------------------
# Kernel
# ---------------------------------------------------------------------------

def _model_average_kernel(x_ref, w_ref, b_ref, o_ref, *, num_models, classes_padded):
    """One batch tile: logits for every model in a single MXU matmul, then
    per-model softmax, average across models, and log — written straight to
    the output block (no VMEM scratch accumulator needed)."""
    # bf16 x bf16 matmul with f32 accumulation; bias add in f32.
    logits = (
        jnp.dot(x_ref[...], w_ref[...], preferred_element_type=jnp.float32)
        + b_ref[...]
    )                                                                # (tb, M*Cp) f32

    # Per-model numerically-stable softmax over its own lane-aligned class
    # segment, accumulated across models (static unroll — M is small).
    acc = None
    for m in range(num_models):
        lm = logits[:, m * classes_padded:(m + 1) * classes_padded]  # (tb, Cp)
        mx = jnp.max(lm, axis=1, keepdims=True)
        e = jnp.exp(lm - mx)
        # Exact divide: denominator is a (tb, 1) column, so an approximate
        # reciprocal saves nothing measurable here.
        p = e / jnp.sum(e, axis=1, keepdims=True)
        acc = p if acc is None else acc + p

    # log(mean) = log(sum) - log(M).  Padded class lanes hold prob 0 -> -inf;
    # the wrapper slices them off before returning.
    o_ref[...] = (jnp.log(acc) - math.log(num_models)).astype(o_ref.dtype)


# ---------------------------------------------------------------------------
# Hardware probes & packing (one-time, hoisted out of the per-call path)
# ---------------------------------------------------------------------------

def _round_up(x, m):
    return ((x + m - 1) // m) * m


def _lane_alignment():
    """Class-axis padding granularity: 256 on v6e/v7x (2x256^2 MXU), 128 on
    v5 and older (128-wide MXU passes)."""
    try:
        kind = jax.devices()[0].device_kind.lower()
        if ("v2" in kind) or ("v3" in kind) or ("v4" in kind) or ("v5" in kind):
            return 128
    except Exception:
        pass
    return 256


def _vmem_capacity_bytes():
    try:
        return int(pltpu.get_tpu_info().vmem_capacity_bytes)
    except Exception:
        return 64 * 1024 * 1024  # conservative: v7x per-TensorCore VMEM


def pack_models(weights, biases, *, lane_align=None):
    """One-time repack of the per-model linear heads (do NOT redo per batch —
    it is a full HBM pass over every weight).

    weights: (M, D, C) f32, biases: (M, 1, C) f32
    returns (w_all bf16 (D, M*Cp), b_all f32 (1, M*Cp), M, C, Cp)
    """
    M, D, C = weights.shape
    if lane_align is None:
        lane_align = _lane_alignment()
    Cp = _round_up(C, lane_align)
    if Cp != C:
        # Padded classes: weight 0, bias -1e30  ->  softmax probability 0.
        weights = jnp.pad(weights, ((0, 0), (0, 0), (0, Cp - C)))
        biases = jnp.pad(biases, ((0, 0), (0, 0), (0, Cp - C)),
                         constant_values=-1e30)
    # Pack all models column-wise: w_all[:, m*Cp:(m+1)*Cp] = W_m.
    w_all = jnp.transpose(weights, (1, 0, 2)).reshape(D, M * Cp)
    b_all = biases.reshape(1, M * Cp)
    # bf16 operands for the MXU; accumulation stays f32 inside the kernel.
    return w_all.astype(jnp.bfloat16), b_all.astype(jnp.float32), M, C, Cp


def _choose_tile_and_vmem(B, D, M, Cp):
    """Pick the batch tile and scoped-VMEM limit from the per-generation VMEM
    capacity, accounting for the resident packed weights, the double-buffered
    x / out tiles, and the (tb, M*Cp) logits / softmax temporaries."""
    N = M * Cp
    cap = _vmem_capacity_bytes()
    budget = cap // 2  # headroom for the compiler / pipeline machinery

    w_bytes = D * N * 2 + N * 4                             # bf16 weights + f32 bias (single-buffered)
    per_row = 2 * D * 2 + 2 * Cp * 4 + (M + 3) * Cp * 4     # x(bf16,2buf) + out(f32,2buf) + logits/e/p/acc

    if w_bytes > budget:
        raise ValueError(
            f"packed weights ({w_bytes} B) exceed the VMEM budget ({budget} B); "
            "a K-tiled reduction variant is required at this size")

    rows_fit = max(8, (budget - w_bytes) // max(per_row, 1))
    tb = 8
    for cand in (1024, 512, 256, 128, 64, 32, 16, 8):
        if cand <= rows_fit:
            tb = cand
            break
    tb = min(tb, _round_up(max(B, 1), 8))
    # Prefer >= 2 grid tiles so dimension_semantics=("parallel",) can actually
    # use both TensorCores on v7x for non-trivial batches.
    if B > 8 and pl.cdiv(B, tb) < 2:
        tb = max(8, (tb // 2) // 8 * 8)

    footprint = w_bytes + tb * per_row
    vmem_limit = min(int(cap * 0.75),
                     max(32 * 1024 * 1024, footprint + 8 * 1024 * 1024))
    return tb, vmem_limit


# ---------------------------------------------------------------------------
# Wrapper
# ---------------------------------------------------------------------------

def model_average(x, packed):
    """x: (B, D) f32; packed: output of pack_models().
    Returns (B, C) f32 log-mean-softmax, matching the PyTorch forward."""
    w_all, b_all, M, C, Cp = packed
    B, D = x.shape
    N = M * Cp

    tb, vmem_limit = _choose_tile_and_vmem(B, D, M, Cp)
    B_pad = _round_up(B, tb)

    x_b = x.astype(jnp.bfloat16)
    if B_pad != B:
        # Full tiles -> unmasked stores and intact batch-tile pipelining.
        x_b = jnp.pad(x_b, ((0, B_pad - B), (0, 0)))
    n_tiles = B_pad // tb

    kernel = functools.partial(_model_average_kernel,
                               num_models=M, classes_padded=Cp)

    def build(weight_pipeline_mode):
        w_kwargs = ({} if weight_pipeline_mode is None
                    else dict(pipeline_mode=weight_pipeline_mode))
        return pl.pallas_call(
            kernel,
            out_shape=jax.ShapeDtypeStruct((B_pad, Cp), jnp.float32),
            grid_spec=pl.GridSpec(
                grid=(n_tiles,),
                in_specs=[
                    pl.BlockSpec((tb, D), lambda i: (i, 0)),                  # x batch tile
                    pl.BlockSpec((D, N), lambda i: (0, 0), **w_kwargs),       # resident packed weights
                    pl.BlockSpec((1, N), lambda i: (0, 0), **w_kwargs),       # resident packed biases
                ],
                out_specs=pl.BlockSpec((tb, Cp), lambda i: (i, 0)),
            ),
            compiler_params=pltpu.CompilerParams(
                dimension_semantics=("parallel",),  # batch tiles shard across TCs (v7x)
                vmem_limit_bytes=vmem_limit,
            ),
        )

    try:
        # Grid-invariant operands: request a single VMEM buffer.
        out_padded = jax.block_until_ready(build(pl.Buffered(1))(x_b, w_all, b_all))
    except Exception:
        # Fallback for backends / versions that reject buffer_count=1.
        out_padded = build(None)(x_b, w_all, b_all)

    return out_padded[:B, :C]


# ---------------------------------------------------------------------------
# References
# ---------------------------------------------------------------------------

def _reference_f32(x, weights, biases):
    """Pure-JAX f32 reference matching the PyTorch forward exactly."""
    logits = jnp.einsum("bd,mdc->mbc", x, weights) + biases        # (M, B, C)
    probs = jax.nn.softmax(logits, axis=2)
    return jnp.log(jnp.mean(probs, axis=0))                        # (B, C)


def _reference_bf16_matmul(x, weights, biases):
    """Same bf16-operand / f32-accumulation matmul as the kernel — isolates
    the kernel logic from the (expected) bf16 rounding of the operands."""
    logits = jnp.einsum("bd,mdc->mbc",
                        x.astype(jnp.bfloat16), weights.astype(jnp.bfloat16),
                        preferred_element_type=jnp.float32) + biases
    probs = jax.nn.softmax(logits, axis=2)
    return jnp.log(jnp.mean(probs, axis=0))


if __name__ == "__main__":
    # Small, deterministic synthetic setup: 3 linear base models.
    B, D, C, M = 8, 32, 16, 3
    key = jax.random.PRNGKey(0)
    kx, kw, kb = jax.random.split(key, 3)

    x = jax.random.normal(kx, (B, D), dtype=jnp.float32)
    weights = 0.1 * jax.random.normal(kw, (M, D, C), dtype=jnp.float32)
    biases = 0.1 * jax.random.normal(kb, (M, 1, C), dtype=jnp.float32)

    packed = pack_models(weights, biases)           # one-time repack (hoisted)
    out = jax.block_until_ready(model_average(x, packed))
    assert out.shape == (B, C)

    # Kernel-logic check (packing, padding, per-model softmax, log-mean):
    # compare against a reference using the same bf16-operand matmul.
    ref_bf16 = _reference_bf16_matmul(x, weights, biases)
    assert jnp.allclose(out, ref_bf16, atol=1e-3, rtol=1e-3), "mismatch vs bf16 reference"

    # Spec check vs the exact f32 PyTorch semantics: tolerance reflects only
    # the bf16 rounding of the matmul operands (worst case ~1e-2 here).
    ref_f32 = _reference_f32(x, weights, biases)
    assert jnp.allclose(out, ref_f32, atol=5e-2, rtol=5e-2), "mismatch vs f32 reference"

    print("KERNEL_OK")
</pallas_src>

<mosaic_0001>
module attributes {stable_mosaic.version = 11 : i64} {
  func.func @_model_average_kernel(%arg0: i32, %arg1: memref<8x32xbf16, #tpu.memory_space<vmem>>, %arg2: memref<32x768xbf16, #tpu.memory_space<vmem>>, %arg3: memref<1x768xf32, #tpu.memory_space<vmem>>, %arg4: memref<8x256xf32, #tpu.memory_space<vmem>>) attributes {dimension_semantics = [#tpu.dimension_semantics<parallel>], iteration_bounds = array<i64: 1>, scalar_prefetch = 0 : i64, scratch_operands = 0 : i64, tpu.core_type = #tpu.core_type<tc>, window_params = [{transform_indices = @transform_0, window_bounds = array<i64: 8, 32>}, {pipeline_mode = #tpu.pipeline_mode<synchronous>, transform_indices = @transform_1, window_bounds = array<i64: 32, 768>}, {pipeline_mode = #tpu.pipeline_mode<synchronous>, transform_indices = @transform_2, window_bounds = array<i64: 1, 768>}, {transform_indices = @transform_3, window_bounds = array<i64: 8, 256>}]} {
    %c0 = arith.constant 0 : index
    %c0_0 = arith.constant 0 : index
    %0 = vector.load %arg1[%c0, %c0_0] : memref<8x32xbf16, #tpu.memory_space<vmem>>, vector<8x32xbf16>
    %c0_1 = arith.constant 0 : index
    %c0_2 = arith.constant 0 : index
    %1 = vector.load %arg2[%c0_1, %c0_2] : memref<32x768xbf16, #tpu.memory_space<vmem>>, vector<32x768xbf16>
    %cst = arith.constant dense<0.000000e+00> : vector<8x768xf32>
    %2 = tpu.matmul %0, %1, %cst {dimension_numbers = #tpu.dot_dimension_numbers<[1], [0], [0], [1], [0, 0, 1, 1], [], []>} : vector<8x32xbf16>, vector<32x768xbf16>, vector<8x768xf32> -> vector<8x768xf32>
    %c0_3 = arith.constant 0 : index
    %c0_4 = arith.constant 0 : index
    %3 = vector.load %arg3[%c0_3, %c0_4] : memref<1x768xf32, #tpu.memory_space<vmem>>, vector<1x768xf32>
    %4 = vector.broadcast %3 : vector<1x768xf32> to vector<8x768xf32>
    %5 = arith.addf %2, %4 : vector<8x768xf32>
    %6 = vector.extract_strided_slice %5 {offsets = [0, 0], sizes = [8, 256], strides = [1, 1]} : vector<8x768xf32> to vector<8x256xf32>
    %cst_5 = arith.constant dense<0xFF800000> : vector<8xf32>
    %7 = vector.multi_reduction <maximumf>, %6, %cst_5 [1] : vector<8x256xf32> to vector<8xf32>
    %8 = vector.shape_cast %7 : vector<8xf32> to vector<8x1xf32>
    %9 = vector.broadcast %8 : vector<8x1xf32> to vector<8x256xf32>
    %10 = arith.subf %6, %9 : vector<8x256xf32>
    %11 = math.exp %10 : vector<8x256xf32>
    %cst_6 = arith.constant dense<0.000000e+00> : vector<8xf32>
    %12 = vector.multi_reduction <add>, %11, %cst_6 [1] : vector<8x256xf32> to vector<8xf32>
    %13 = vector.shape_cast %12 : vector<8xf32> to vector<8x1xf32>
    %14 = vector.broadcast %13 : vector<8x1xf32> to vector<8x256xf32>
    %15 = arith.divf %11, %14 : vector<8x256xf32>
    %16 = vector.extract_strided_slice %5 {offsets = [0, 256], sizes = [8, 256], strides = [1, 1]} : vector<8x768xf32> to vector<8x256xf32>
    %cst_7 = arith.constant dense<0xFF800000> : vector<8xf32>
    %17 = vector.multi_reduction <maximumf>, %16, %cst_7 [1] : vector<8x256xf32> to vector<8xf32>
    %18 = vector.shape_cast %17 : vector<8xf32> to vector<8x1xf32>
    %19 = vector.broadcast %18 : vector<8x1xf32> to vector<8x256xf32>
    %20 = arith.subf %16, %19 : vector<8x256xf32>
    %21 = math.exp %20 : vector<8x256xf32>
    %cst_8 = arith.constant dense<0.000000e+00> : vector<8xf32>
    %22 = vector.multi_reduction <add>, %21, %cst_8 [1] : vector<8x256xf32> to vector<8xf32>
    %23 = vector.shape_cast %22 : vector<8xf32> to vector<8x1xf32>
    %24 = vector.broadcast %23 : vector<8x1xf32> to vector<8x256xf32>
    %25 = arith.divf %21, %24 : vector<8x256xf32>
    %26 = arith.addf %15, %25 : vector<8x256xf32>
    %27 = vector.extract_strided_slice %5 {offsets = [0, 512], sizes = [8, 256], strides = [1, 1]} : vector<8x768xf32> to vector<8x256xf32>
    %cst_9 = arith.constant dense<0xFF800000> : vector<8xf32>
    %28 = vector.multi_reduction <maximumf>, %27, %cst_9 [1] : vector<8x256xf32> to vector<8xf32>
    %29 = vector.shape_cast %28 : vector<8xf32> to vector<8x1xf32>
    %30 = vector.broadcast %29 : vector<8x1xf32> to vector<8x256xf32>
    %31 = arith.subf %27, %30 : vector<8x256xf32>
    %32 = math.exp %31 : vector<8x256xf32>
    %cst_10 = arith.constant dense<0.000000e+00> : vector<8xf32>
    %33 = vector.multi_reduction <add>, %32, %cst_10 [1] : vector<8x256xf32> to vector<8xf32>
    %34 = vector.shape_cast %33 : vector<8xf32> to vector<8x1xf32>
    %35 = vector.broadcast %34 : vector<8x1xf32> to vector<8x256xf32>
    %36 = arith.divf %32, %35 : vector<8x256xf32>
    %37 = arith.addf %26, %36 : vector<8x256xf32>
    %38 = math.log %37 : vector<8x256xf32>
    %cst_11 = arith.constant 1.09861231 : f32
    %39 = vector.broadcast %cst_11 : f32 to vector<8x256xf32>
    %40 = arith.subf %38, %39 : vector<8x256xf32>
    %c0_12 = arith.constant 0 : index
    %c0_13 = arith.constant 0 : index
    %41 = vector.load %arg4[%c0_12, %c0_13] : memref<8x256xf32, #tpu.memory_space<vmem>>, vector<8x256xf32>
    tpu.vector_store %arg4[%c0_12, %c0_13], %40 {strides = array<i32>} : memref<8x256xf32, #tpu.memory_space<vmem>>, vector<8x256xf32>,
    return
  }
  func.func @transform_0(%arg0: i32) -> (i32, i32) {
    %c0_i32 = arith.constant 0 : i32
    %c0_i32_0 = arith.constant 0 : i32
    return %arg0, %c0_i32 : i32, i32
  }
  func.func @transform_1(%arg0: i32) -> (i32, i32) {
    %c0_i32 = arith.constant 0 : i32
    %c0_i32_0 = arith.constant 0 : i32
    %c0_i32_1 = arith.constant 0 : i32
    return %c0_i32, %c0_i32_0 : i32, i32
  }
  func.func @transform_2(%arg0: i32) -> (i32, i32) {
    %c0_i32 = arith.constant 0 : i32
    %c0_i32_0 = arith.constant 0 : i32
    %c0_i32_1 = arith.constant 0 : i32
    return %c0_i32, %c0_i32_0 : i32, i32
  }
  func.func @transform_3(%arg0: i32) -> (i32, i32) {
    %c0_i32 = arith.constant 0 : i32
    %c0_i32_0 = arith.constant 0 : i32
    return %arg0, %c0_i32 : i32, i32
  }
}

module attributes {stable_mosaic.version = 11 : i64} {
  func.func @_model_average_kernel(%arg0: i32, %arg1: memref<8x32xbf16, #tpu.memory_space<vmem>>, %arg2: memref<32x768xbf16, #tpu.memory_space<vmem>>, %arg3: memref<1x768xf32, #tpu.memory_space<vmem>>, %arg4: memref<8x256xf32, #tpu.memory_space<vmem>>) attributes {dimension_semantics = [#tpu.dimension_semantics<parallel>], iteration_bounds = array<i64: 1>, scalar_prefetch = 0 : i64, scratch_operands = 0 : i64, tpu.core_type = #tpu.core_type<tc>, window_params = [{transform_indices = @transform_0, window_bounds = array<i64: 8, 32>}, {pipeline_mode = #tpu.pipeline_mode<synchronous>, transform_indices = @transform_1, window_bounds = array<i64: 32, 768>}, {pipeline_mode = #tpu.pipeline_mode<synchronous>, transform_indices = @transform_2, window_bounds = array<i64: 1, 768>}, {transform_indices = @transform_3, window_bounds = array<i64: 8, 256>}]} {
    %c0 = arith.constant 0 : index
    %c0_0 = arith.constant 0 : index
    %0 = vector.load %arg1[%c0, %c0_0] : memref<8x32xbf16, #tpu.memory_space<vmem>>, vector<8x32xbf16>
    %c0_1 = arith.constant 0 : index
    %c0_2 = arith.constant 0 : index
    %1 = vector.load %arg2[%c0_1, %c0_2] : memref<32x768xbf16, #tpu.memory_space<vmem>>, vector<32x768xbf16>
    %cst = arith.constant dense<0.000000e+00> : vector<8x768xf32>
    %2 = tpu.matmul %0, %1, %cst {dimension_numbers = #tpu.dot_dimension_numbers<[1], [0], [0], [1], [0, 0, 1, 1], [], []>} : vector<8x32xbf16>, vector<32x768xbf16>, vector<8x768xf32> -> vector<8x768xf32>
    %c0_3 = arith.constant 0 : index
    %c0_4 = arith.constant 0 : index
    %3 = vector.load %arg3[%c0_3, %c0_4] : memref<1x768xf32, #tpu.memory_space<vmem>>, vector<1x768xf32>
    %4 = vector.broadcast %3 : vector<1x768xf32> to vector<8x768xf32>
    %5 = arith.addf %2, %4 : vector<8x768xf32>
    %6 = vector.extract_strided_slice %5 {offsets = [0, 0], sizes = [8, 256], strides = [1, 1]} : vector<8x768xf32> to vector<8x256xf32>
    %cst_5 = arith.constant dense<0xFF800000> : vector<8xf32>
    %7 = vector.multi_reduction <maximumf>, %6, %cst_5 [1] : vector<8x256xf32> to vector<8xf32>
    %8 = vector.shape_cast %7 : vector<8xf32> to vector<8x1xf32>
    %9 = vector.broadcast %8 : vector<8x1xf32> to vector<8x256xf32>
    %10 = arith.subf %6, %9 : vector<8x256xf32>
    %11 = math.exp %10 : vector<8x256xf32>
    %cst_6 = arith.constant dense<0.000000e+00> : vector<8xf32>
    %12 = vector.multi_reduction <add>, %11, %cst_6 [1] : vector<8x256xf32> to vector<8xf32>
    %13 = vector.shape_cast %12 : vector<8xf32> to vector<8x1xf32>
    %14 = vector.broadcast %13 : vector<8x1xf32> to vector<8x256xf32>
    %15 = arith.divf %11, %14 : vector<8x256xf32>
    %16 = vector.extract_strided_slice %5 {offsets = [0, 256], sizes = [8, 256], strides = [1, 1]} : vector<8x768xf32> to vector<8x256xf32>
    %cst_7 = arith.constant dense<0xFF800000> : vector<8xf32>
    %17 = vector.multi_reduction <maximumf>, %16, %cst_7 [1] : vector<8x256xf32> to vector<8xf32>
    %18 = vector.shape_cast %17 : vector<8xf32> to vector<8x1xf32>
    %19 = vector.broadcast %18 : vector<8x1xf32> to vector<8x256xf32>
    %20 = arith.subf %16, %19 : vector<8x256xf32>
    %21 = math.exp %20 : vector<8x256xf32>
    %cst_8 = arith.constant dense<0.000000e+00> : vector<8xf32>
    %22 = vector.multi_reduction <add>, %21, %cst_8 [1] : vector<8x256xf32> to vector<8xf32>
    %23 = vector.shape_cast %22 : vector<8xf32> to vector<8x1xf32>
    %24 = vector.broadcast %23 : vector<8x1xf32> to vector<8x256xf32>
    %25 = arith.divf %21, %24 : vector<8x256xf32>
    %26 = arith.addf %15, %25 : vector<8x256xf32>
    %27 = vector.extract_strided_slice %5 {offsets = [0, 512], sizes = [8, 256], strides = [1, 1]} : vector<8x768xf32> to vector<8x256xf32>
    %cst_9 = arith.constant dense<0xFF800000> : vector<8xf32>
    %28 = vector.multi_reduction <maximumf>, %27, %cst_9 [1] : vector<8x256xf32> to vector<8xf32>
    %29 = vector.shape_cast %28 : vector<8xf32> to vector<8x1xf32>
    %30 = vector.broadcast %29 : vector<8x1xf32> to vector<8x256xf32>
    %31 = arith.subf %27, %30 : vector<8x256xf32>
    %32 = math.exp %31 : vector<8x256xf32>
    %cst_10 = arith.constant dense<0.000000e+00> : vector<8xf32>
    %33 = vector.multi_reduction <add>, %32, %cst_10 [1] : vector<8x256xf32> to vector<8xf32>
    %34 = vector.shape_cast %33 : vector<8xf32> to vector<8x1xf32>
    %35 = vector.broadcast %34 : vector<8x1xf32> to vector<8x256xf32>
    %36 = arith.divf %32, %35 : vector<8x256xf32>
    %37 = arith.addf %26, %36 : vector<8x256xf32>
    %38 = math.log %37 : vector<8x256xf32>
    %cst_11 = arith.constant 1.09861231 : f32
    %39 = vector.broadcast %cst_11 : f32 to vector<8x256xf32>
    %40 = arith.subf %38, %39 : vector<8x256xf32>
    %c0_12 = arith.constant 0 : index
    %c0_13 = arith.constant 0 : index
    %41 = vector.load %arg4[%c0_12, %c0_13] : memref<8x256xf32, #tpu.memory_space<vmem>>, vector<8x256xf32>
    tpu.vector_store %arg4[%c0_12, %c0_13], %40 {strides = array<i32>} : memref<8x256xf32, #tpu.memory_space<vmem>>, vector<8x256xf32>,
    return
  }
  func.func @transform_0(%arg0: i32) -> (i32, i32) {
    %c0_i32 = arith.constant 0 : i32
    %c0_i32_0 = arith.constant 0 : i32
    return %arg0, %c0_i32 : i32, i32
  }
  func.func @transform_1(%arg0: i32) -> (i32, i32) {
    %c0_i32 = arith.constant 0 : i32
    %c0_i32_0 = arith.constant 0 : i32
    %c0_i32_1 = arith.constant 0 : i32
    return %c0_i32, %c0_i32_0 : i32, i32
  }
  func.func @transform_2(%arg0: i32) -> (i32, i32) {
    %c0_i32 = arith.constant 0 : i32
    %c0_i32_0 = arith.constant 0 : i32
    %c0_i32_1 = arith.constant 0 : i32
    return %c0_i32, %c0_i32_0 : i32, i32
  }
  func.func @transform_3(%arg0: i32) -> (i32, i32) {
    %c0_i32 = arith.constant 0 : i32
    %c0_i32_0 = arith.constant 0 : i32
    return %arg0, %c0_i32 : i32, i32
  }
}

</mosaic_0001>

<bundles_post_ra>
// kernel: tpu_custom_call.1
= control target key start
LH: loop header
LB: loop body
LE: loop exit
PB: predicated region body
PF: predicated region fallthrough
CT: control target
= control target key end

     0   :  { %8 = vsyncpa [#allocation3], 0  ;;  %s554_s0 = inlined_call_operand.hbm [shape: bf16[8,32], index: 0, kind: input, shape index: {}]   ;;  %s555_s1 = inlined_call_operand.hbm [shape: bf16[32,768], index: 1, kind: input, shape index: {}]   ;;  %s556_s2 = inlined_call_operand.vmem [shape: f32[1,768], index: 2, kind: input, shape index: {}]   ;;  %s557_s3 = inlined_call_operand.hbm [shape: f32[8,256], index: 3, kind: output, shape index: {}]  }
   0x1   :  { %9 = vsyncpa [#allocation6], 0 }
   0x2   :  { %10 = vsyncpa [#allocation4], 0  ;;  %s482_s12 = smov [#allocation2]   ;;  %s483_s14 = smov [#allocation5]  }
   0x3   :  { %s17_s13 = sshll.u32 %s482_s12, 4  ;;  %s26_s15 = sshll.u32 %s483_s14, 4  ;;  %s18_s13 = int_to_ptr.vmem [resolvable:$true] %s17_s13  ;;  %s508_s15 = int_to_ptr.vmem [resolvable:$true] %s26_s15 }
   0x4   :  { %s410_s18 = scalar_lea.hbm %s554_s0, 64 }
   0x5   :  { %p411_p0 = scmp.ne.s32.totalorder %s554_s0, %s410_s18  ;;  %p414_p1 = scmp.lt.u32.totalorder %s410_s18, %s554_s0 }
   0x7   :  { %p416_p2 = pnand %p414_p1, %p411_p0 }
   0x9   :  { %419 = shalt.err (!%p416_p2)
}
   0xa   :  { %s420_s23 = scalar_lea.vmem %s18_s13, 64  ;;  %p425_p4 = scmp.lt.s32.totalorder %s18_s13, %s18_s13 }
   0xb   :  { %p421_p3 = scmp.ne.s32.totalorder %s18_s13, %s420_s23  ;;  %p426_p5 = scmp.lt.s32.totalorder %s420_s23, %s420_s23 }
   0xd   :  { %p427_p6 = por %p426_p5, %p425_p4 }
   0xf   :  { %p428_p7 = pnand %p427_p6, %p421_p3 }
  0x11   :  { %431 = shalt.err (!%p428_p7)
}
  0x12   :  { %20 = dma.hbm_to_vmem [thread:$0]  %s554_s0, 64, %s18_s13, [#allocation3]  }
  0x13   :  { %s432_s28 = scalar_lea.hbm %s555_s1, 1536 }
  0x14   :  { %p433_p8 = scmp.ne.s32.totalorder %s555_s1, %s432_s28  ;;  %p436_p9 = scmp.lt.u32.totalorder %s432_s28, %s555_s1 }
  0x16   :  { %p438_p10 = pnand %p436_p9, %p433_p8 }
  0x18   :  { %441 = shalt.err (!%p438_p10)
}
  0x19   :  { %s442_s6 = scalar_lea.vmem %s508_s15, 1536  ;;  %p447_p12 = scmp.lt.s32.totalorder %s508_s15, %s508_s15 }
  0x1a   :  { %p443_p11 = scmp.ne.s32.totalorder %s508_s15, %s442_s6  ;;  %p448_p13 = scmp.lt.s32.totalorder %s442_s6, %s442_s6 }
  0x1c   :  { %p449_p0 = por %p448_p13, %p447_p12 }
  0x1e   :  { %p450_p1 = pnand %p449_p0, %p443_p11 }
  0x20   :  { %453 = shalt.err (!%p450_p1)
}
  0x21   :  { %s484_s0 = smov 384   ;;  %s485_s7 = smov 24  }
  0x22   :  { %32 = dma.hbm_to_vmem [thread:$0]  %s555_s1, 1536, %s508_s15, [#allocation6], %s484_s0, %s484_s0, %s485_s7  }
  0x23   :  { %476 = dma.done.wait [#allocation3], 64  }
  0x24   :  { %477 = vsyncadd [#allocation3], 4294967232 }
  0x25   :  { %478 = dma.done.wait [#allocation6], 1536  }
  0x26   :  { %479 = vsyncadd [#allocation6], 4294965760  ;;  %v486_v0 = vmov 0   ;;  %v370_v1 = vld [vmem:[#allocation5 + $0x4] ss:$24 sps:$4 sm:$0xff]   ;;  %vm147_vm0 = vcmask 261120   ;;  %v57_v14 = vlaneseq }
  0x27   :  { %183 = vmatprep.mubr.bf16.mxu0 %v486_v0  ;;  %224 = vmatprep.mubr.bf16.mxu1 %v486_v0  ;;  %v372_v2 = vld [vmem:[#allocation5] ss:$24 sps:$4 sm:$0xff]   ;;  %v373_v3 = vld [vmem:[#allocation5 + $0x34] ss:$24 sps:$4 sm:$0xff]   ;;  %v377_v5 = vld [vmem:[#allocation5 + $0x30] ss:$24 sps:$4 sm:$0xff]  }
  0x28   :  { %151 = vmatprep.subr.bf16.mxu0 %v370_v1  ;;  %v375_v4 = vld [vmem:[#allocation5 + $0xc] ss:$24 sps:$4 sm:$0xff]   ;;  %v378_v6 = vld [vmem:[#allocation5 + $0x8] ss:$24 sps:$4 sm:$0xff]   ;;  %v379_v7 = vld [vmem:[#allocation5 + $0x3c] ss:$24 sps:$4 sm:$0xff]  }
  0x29   :  { %152 = vmatpush1.bf16.msra.mxu0 %v372_v2  ;;  %192 = vmatprep.subr.bf16.mxu1 %v375_v4  ;;  %v42_v8 = vld [vmem:[#allocation2] sm:$0xf]  ;;  %v383_v9 = vld [vmem:[#allocation5 + $0x14] ss:$24 sps:$4 sm:$0xff]   ;;  %v384_v10 = vld [vmem:[#allocation5 + $0x38] ss:$24 sps:$4 sm:$0xff]  }
  0x2a   :  { %153 = vmatprep.subr.bf16.mxu0 %v373_v3  ;;  %193 = vmatpush1.bf16.msra.mxu1 %v378_v6  ;;  %v381_v11 = vld [vmem:[#allocation5 + $0x10] ss:$24 sps:$4 sm:$0xff]   ;;  %v387_v12 = vld [vmem:[#allocation5 + $0x44] ss:$24 sps:$4 sm:$0xff]   ;;  %v385_v13 = vld [vmem:[#allocation5 + $0x40] ss:$24 sps:$4 sm:$0xff]  }
  0x2b   :  { %194 = vmatprep.subr.bf16.mxu1 %v379_v7  ;;  %v58_v15 = vshrl.u32 %v57_v14, 7  ;;  %v55_v17 = vld [vmem:[%s556_s2] sm:$0x3f]  ;;  %s487_s2 = smov [#allocation7]  }
  0x2c   :  { %s337_s11 = sshll.u32 %s487_s2, 4  ;;  %s338_s11 = int_to_ptr.vmem [resolvable:$true] %s337_s11 }
  0x2d   :  { %154 = vmatpush1.bf16.msra.mxu0 %v377_v5  ;;  %v59_v16 = vsub.s32 0, %v58_v15  ;;  %v63_v18 = vsub.s32 1, %v58_v15  ;;  %v67_v19 = vsub.s32 2, %v58_v15  ;;  %v71_v21 = vsub.s32 3, %v58_v15  ;;  %s454_s12 = scalar_lea.vmem %s338_s11, 256  ;;  %p459_p3 = scmp.lt.s32.totalorder %s338_s11, %s338_s11 }
  0x2e   :  { %233 = vmatprep.subr.bf16.mxu0 %v383_v9  ;;  %195 = vmatpush1.bf16.msra.mxu1 %v384_v10  ;;  %v75_v28 = vsub.s32 4, %v58_v15  ;;  %v79_v31 = vsub.s32 5, %v58_v15  ;;  %p455_p2 = scmp.ne.s32.totalorder %s338_s11, %s454_s12  ;;  %p460_p4 = scmp.lt.s32.totalorder %s454_s12, %s454_s12 }
  0x2f   :  { %v60_v20 = vrot.slane %v55_v17, %v59_v16  ;;  %v64_v22 = vrot.slane %v55_v17, %v63_v18  ;;  %v68_v24 = vrot.slane %v55_v17, %v67_v19  ;;  %v72_v27 = vrot.slane %v55_v17, %v71_v21 }
  0x30   :  { %359 = vmatmul.mubr.msk.bf16.vlgmr.msra.gmra.mrb[0].mxu0 %vm147_vm0, %v42_v8  ;;  %v76_v39 = vrot.slane %v55_v17, %v75_v28  ;;  %v80_v41 = vrot.slane %v55_v17, %v79_v31  ;;  %p461_p5 = por %p460_p4, %p459_p3 }
  0x31   :  { %234 = vmatpush1.bf16.msra.mxu0 %v381_v11  ;;  %265 = vmatprep.mubr.bf16.mxu0 %v486_v0 }
  0x32   :  { %235 = vmatprep.subr.bf16.mxu0 %v387_v12  ;;  %360 = vmatmul.mubr.msk.bf16.vlgmr.msra.gmra.mrb[0].mxu1 %vm147_vm0, %v42_v8  ;;  %p462_p6 = pnand %p461_p5, %p455_p2 }
  0x35   :  { %236 = vmatpush1.bf16.msra.mxu0 %v385_v13 }
  0x38   :  { %361 = vmatmul.mubr.msk.bf16.vlgmr.msra.gmra.mrb[4].mxu0 %vm147_vm0, %v42_v8 }
 0x103   :  { %v185_v23 = vpop.f32.mrb[0].mxu0 }
 0x104   :  { %v186_v25 = vadd.f32 %v185_v23, %v60_v20  ;;  %v187_v26 = vpop.f32.mrb[1].mxu0 }
 0x105   :  { %v188_v29 = vadd.f32 %v187_v26, %v64_v22  ;;  %v189_v30 = vpop.f32.mrb[2].mxu0  ;;  %v226_v33 = vpop.f32.mrb[0].mxu1 }
 0x106   :  { %v190_v32 = vpop.f32.mrb[3].mxu0  ;;  %v227_v34 = vadd.f32 %v226_v33, %v68_v24  ;;  %v228_v35 = vpop.f32.mrb[1].mxu1 }
 0x107   :  { %v274_v36 = vmax.f32 %v186_v25, %v188_v29  ;;  %v229_v37 = vadd.f32 %v228_v35, %v72_v27  ;;  %v230_v38 = vpop.f32.mrb[2].mxu1 }
 0x108   :  { %v231_v40 = vpop.f32.mrb[3].mxu1 }
 0x109   :  { %275 = vmax.xlane.f32.xlu0 %v274_v36  ;;  %v289_v42 = vmax.f32 %v227_v34, %v229_v37 }
 0x10b   :  { %v267_v43 = vpop.f32.mrb[4].mxu0 }
 0x10c   :  { %v268_v44 = vadd.f32 %v267_v43, %v76_v39  ;;  %v269_v45 = vpop.f32.mrb[5].mxu0 }
 0x10d   :  { %v270_v46 = vadd.f32 %v269_v45, %v80_v41  ;;  %v271_v47 = vpop.f32.mrb[6].mxu0  ;;  %290 = vmax.xlane.f32.xlu0 %v289_v42 }
 0x10e   :  { %v272_v48 = vpop.f32.mrb[7].mxu0 }
 0x10f   :  { %v306_v49 = vmax.f32 %v268_v44, %v270_v46 }
 0x111   :  { %307 = vmax.xlane.f32.xlu1 %v306_v49 }
 0x196   :  { %v276_v50 = vpop.xlane.xlu0 %275 }
 0x197   :  { %v277_v51 = vsub.f32 %v186_v25, %v276_v50  ;;  %v278_v52 = vsub.f32 %v188_v29, %v276_v50 }
 0x199   :  { %v279_v53 = vmul.f32 1.442695, %v277_v51  ;;  %v281_v54 = vmul.f32 1.442695, %v278_v52 }
 0x19a   :  { %v291_v55 = vpop.xlane.xlu0 %290 }
 0x19b   :  { %388 = vpow2.f32 %v279_v53  ;;  %v292_v56 = vsub.f32 %v227_v34, %v291_v55  ;;  %v293_v57 = vsub.f32 %v229_v37, %v291_v55 }
 0x19c   :  { %390 = vpow2.f32 %v281_v54 }
 0x19d   :  { %v294_v58 = vmul.f32 1.442695, %v292_v56  ;;  %v296_v59 = vmul.f32 1.442695, %v293_v57 }
 0x19e   :  { %v308_v60 = vpop.xlane.xlu1 %307 }
 0x19f   :  { %392 = vpow2.f32 %v294_v58  ;;  %v309_v61 = vsub.f32 %v268_v44, %v308_v60  ;;  %v310_v62 = vsub.f32 %v270_v46, %v308_v60 }
 0x1a0   :  { %394 = vpow2.f32 %v296_v59 }
 0x1a1   :  { %v311_v63 = vmul.f32 1.442695, %v309_v61  ;;  %v313_v0 = vmul.f32 1.442695, %v310_v62 }
 0x1a3   :  { %396 = vpow2.f32 %v311_v63 }
 0x1a4   :  { %398 = vpow2.f32 %v313_v0 }
 0x1a5   :  { %v389_v1 = vpop.eup %388 }
 0x1a6   :  { %v391_v2 = vpop.eup %390 }
 0x1a7   :  { %v283_v3 = vadd.f32 %v391_v2, %v389_v1 }
 0x1a9   :  { %v393_v4 = vpop.eup %392  ;;  %284 = vadd.xlane.f32.xlu1 %v283_v3 }
 0x1aa   :  { %v395_v5 = vpop.eup %394 }
 0x1ab   :  { %v298_v6 = vadd.f32 %v395_v5, %v393_v4 }
 0x1ad   :  { %v397_v7 = vpop.eup %396  ;;  %299 = vadd.xlane.f32.xlu0 %v298_v6 }
 0x1ae   :  { %v399_v8 = vpop.eup %398 }
 0x1af   :  { %v315_v9 = vadd.f32 %v399_v8, %v397_v7 }
 0x1b1   :  { %316 = vadd.xlane.f32.xlu1 %v315_v9 }
 0x236   :  { %v285_v10 = vpop.xlane.xlu1 %284 }
 0x237   :  { %400 = vrcp.f32 %v285_v10 }
 0x23a   :  { %v300_v11 = vpop.xlane.xlu0 %299 }
 0x23b   :  { %402 = vrcp.f32 %v300_v11 }
 0x23e   :  { %v317_v12 = vpop.xlane.xlu1 %316 }
 0x23f   :  { %404 = vrcp.f32 %v317_v12 }
 0x241   :  { %v401_v13 = vpop.eup %400 }
 0x242   :  { %v287_v17 = vmul.f32 %v401_v13, %v389_v1  ;;  %v288_v18 = vmul.f32 %v401_v13, %v391_v2 }
 0x245   :  { %v403_v14 = vpop.eup %402 }
 0x246   :  { %v302_v15 = vmul.f32 %v403_v14, %v393_v4  ;;  %v303_v16 = vmul.f32 %v403_v14, %v395_v5 }
 0x248   :  { %v304_v22 = vadd.f32 %v302_v15, %v287_v17  ;;  %v305_v23 = vadd.f32 %v303_v16, %v288_v18 }
 0x249   :  { %v405_v19 = vpop.eup %404 }
 0x24a   :  { %v319_v20 = vmul.f32 %v405_v19, %v397_v7  ;;  %v320_v21 = vmul.f32 %v405_v19, %v399_v8 }
 0x24c   :  { %v321_v24 = vadd.f32 %v319_v20, %v304_v22  ;;  %v322_v25 = vadd.f32 %v320_v21, %v305_v23 }
 0x24e   :  { %406 = vlog2.f32 %v321_v24 }
 0x24f   :  { %408 = vlog2.f32 %v322_v25 }
 0x258   :  { %v407_v26 = vpop.eup %406 }
 0x259   :  { %v409_v27 = vpop.eup %408  ;;  %v324_v28 = vmul.f32 0.6931472, %v407_v26 }
 0x25a   :  { %v326_v29 = vmul.f32 0.6931472, %v409_v27 }
 0x25b   :  { %v362_v30 = vadd.f32 -1.0986123, %v324_v28 }
 0x25c   :  { %v363_v31 = vadd.f32 -1.0986123, %v326_v29 }
 0x25d   :  { %329 = vst [vmem:[#allocation7] sm:$0xff] %v362_v30 }
 0x25e   :  { %330 = vst [vmem:[#allocation7 + $0x8] sm:$0xff] %v363_v31 }
 0x25f   :  { %465 = shalt.err (!%p462_p6)
}
 0x260   :  { %s466_s15 = scalar_lea.hbm %s557_s3, 256 }
 0x261   :  { %p467_p7 = scmp.ne.s32.totalorder %s557_s3, %s466_s15  ;;  %p470_p8 = scmp.lt.u32.totalorder %s466_s15, %s557_s3 }
 0x263   :  { %p472_p9 = pnand %p470_p8, %p467_p7 }
 0x265   :  { %475 = shalt.err (!%p472_p9)
}
 0x266   :  { %340 = dma.vmem_to_hbm [thread:$0]  %s338_s11, 256, %s557_s3, [#allocation4]  }
 0x267   :  { %480 = dma.done.wait [#allocation4], 256  }
 0x268   :  { %481 = vsyncadd [#allocation4], 4294967040 }
 0x269   :  { %344 = vsyncpa [#allocation3], 1 }
 0x26a   :  { %345 = vsyncpa [#allocation6], 1 }
 0x26b   :  { %346 = vsyncpa [#allocation4], 1 }

// kernel: tpu_custom_call.1
= control target key start
LH: loop header
LB: loop body
LE: loop exit
PB: predicated region body
PF: predicated region fallthrough
CT: control target
= control target key end

     0   :  { %8 = vsyncpa [#allocation3], 0  ;;  %s554_s0 = inlined_call_operand.hbm [shape: bf16[8,32], index: 0, kind: input, shape index: {}]   ;;  %s555_s1 = inlined_call_operand.hbm [shape: bf16[32,768], index: 1, kind: input, shape index: {}]   ;;  %s556_s2 = inlined_call_operand.vmem [shape: f32[1,768], index: 2, kind: input, shape index: {}]   ;;  %s557_s3 = inlined_call_operand.hbm [shape: f32[8,256], index: 3, kind: output, shape index: {}]  }
   0x1   :  { %9 = vsyncpa [#allocation6], 0 }
   0x2   :  { %10 = vsyncpa [#allocation4], 0  ;;  %s482_s12 = smov [#allocation2]   ;;  %s483_s14 = smov [#allocation5]  }
   0x3   :  { %s17_s13 = sshll.u32 %s482_s12, 4  ;;  %s26_s15 = sshll.u32 %s483_s14, 4  ;;  %s18_s13 = int_to_ptr.vmem [resolvable:$true] %s17_s13  ;;  %s508_s15 = int_to_ptr.vmem [resolvable:$true] %s26_s15 }
   0x4   :  { %s410_s18 = scalar_lea.hbm %s554_s0, 64 }
   0x5   :  { %p411_p0 = scmp.ne.s32.totalorder %s554_s0, %s410_s18  ;;  %p414_p1 = scmp.lt.u32.totalorder %s410_s18, %s554_s0 }
   0x7   :  { %p416_p2 = pnand %p414_p1, %p411_p0 }
   0x9   :  { %419 = shalt.err (!%p416_p2)
}
   0xa   :  { %s420_s23 = scalar_lea.vmem %s18_s13, 64  ;;  %p425_p4 = scmp.lt.s32.totalorder %s18_s13, %s18_s13 }
   0xb   :  { %p421_p3 = scmp.ne.s32.totalorder %s18_s13, %s420_s23  ;;  %p426_p5 = scmp.lt.s32.totalorder %s420_s23, %s420_s23 }
   0xd   :  { %p427_p6 = por %p426_p5, %p425_p4 }
   0xf   :  { %p428_p7 = pnand %p427_p6, %p421_p3 }
  0x11   :  { %431 = shalt.err (!%p428_p7)
}
  0x12   :  { %20 = dma.hbm_to_vmem [thread:$0]  %s554_s0, 64, %s18_s13, [#allocation3]  }
  0x13   :  { %s432_s28 = scalar_lea.hbm %s555_s1, 1536 }
  0x14   :  { %p433_p8 = scmp.ne.s32.totalorder %s555_s1, %s432_s28  ;;  %p436_p9 = scmp.lt.u32.totalorder %s432_s28, %s555_s1 }
  0x16   :  { %p438_p10 = pnand %p436_p9, %p433_p8 }
  0x18   :  { %441 = shalt.err (!%p438_p10)
}
  0x19   :  { %s442_s6 = scalar_lea.vmem %s508_s15, 1536  ;;  %p447_p12 = scmp.lt.s32.totalorder %s508_s15, %s508_s15 }
  0x1a   :  { %p443_p11 = scmp.ne.s32.totalorder %s508_s15, %s442_s6  ;;  %p448_p13 = scmp.lt.s32.totalorder %s442_s6, %s442_s6 }
  0x1c   :  { %p449_p0 = por %p448_p13, %p447_p12 }
  0x1e   :  { %p450_p1 = pnand %p449_p0, %p443_p11 }
  0x20   :  { %453 = shalt.err (!%p450_p1)
}
  0x21   :  { %s484_s0 = smov 384   ;;  %s485_s7 = smov 24  }
  0x22   :  { %32 = dma.hbm_to_vmem [thread:$0]  %s555_s1, 1536, %s508_s15, [#allocation6], %s484_s0, %s484_s0, %s485_s7  }
  0x23   :  { %476 = dma.done.wait [#allocation3], 64  }
  0x24   :  { %477 = vsyncadd [#allocation3], 4294967232 }
  0x25   :  { %478 = dma.done.wait [#allocation6], 1536  }
  0x26   :  { %479 = vsyncadd [#allocation6], 4294965760  ;;  %v486_v0 = vmov 0   ;;  %v370_v1 = vld [vmem:[#allocation5 + $0x4] ss:$24 sps:$4 sm:$0xff]   ;;  %vm147_vm0 = vcmask 261120   ;;  %v57_v14 = vlaneseq }
  0x27   :  { %183 = vmatprep.mubr.bf16.mxu0 %v486_v0  ;;  %224 = vmatprep.mubr.bf16.mxu1 %v486_v0  ;;  %v372_v2 = vld [vmem:[#allocation5] ss:$24 sps:$4 sm:$0xff]   ;;  %v373_v3 = vld [vmem:[#allocation5 + $0x34] ss:$24 sps:$4 sm:$0xff]   ;;  %v377_v5 = vld [vmem:[#allocation5 + $0x30] ss:$24 sps:$4 sm:$0xff]  }
  0x28   :  { %151 = vmatprep.subr.bf16.mxu0 %v370_v1  ;;  %v375_v4 = vld [vmem:[#allocation5 + $0xc] ss:$24 sps:$4 sm:$0xff]   ;;  %v378_v6 = vld [vmem:[#allocation5 + $0x8] ss:$24 sps:$4 sm:$0xff]   ;;  %v379_v7 = vld [vmem:[#allocation5 + $0x3c] ss:$24 sps:$4 sm:$0xff]  }
  0x29   :  { %152 = vmatpush1.bf16.msra.mxu0 %v372_v2  ;;  %192 = vmatprep.subr.bf16.mxu1 %v375_v4  ;;  %v42_v8 = vld [vmem:[#allocation2] sm:$0xf]  ;;  %v383_v9 = vld [vmem:[#allocation5 + $0x14] ss:$24 sps:$4 sm:$0xff]   ;;  %v384_v10 = vld [vmem:[#allocation5 + $0x38] ss:$24 sps:$4 sm:$0xff]  }
  0x2a   :  { %153 = vmatprep.subr.bf16.mxu0 %v373_v3  ;;  %193 = vmatpush1.bf16.msra.mxu1 %v378_v6  ;;  %v381_v11 = vld [vmem:[#allocation5 + $0x10] ss:$24 sps:$4 sm:$0xff]   ;;  %v387_v12 = vld [vmem:[#allocation5 + $0x44] ss:$24 sps:$4 sm:$0xff]   ;;  %v385_v13 = vld [vmem:[#allocation5 + $0x40] ss:$24 sps:$4 sm:$0xff]  }
  0x2b   :  { %194 = vmatprep.subr.bf16.mxu1 %v379_v7  ;;  %v58_v15 = vshrl.u32 %v57_v14, 7  ;;  %v55_v17 = vld [vmem:[%s556_s2] sm:$0x3f]  ;;  %s487_s2 = smov [#allocation7]  }
  0x2c   :  { %s337_s11 = sshll.u32 %s487_s2, 4  ;;  %s338_s11 = int_to_ptr.vmem [resolvable:$true] %s337_s11 }
  0x2d   :  { %154 = vmatpush1.bf16.msra.mxu0 %v377_v5  ;;  %v59_v16 = vsub.s32 0, %v58_v15  ;;  %v63_v18 = vsub.s32 1, %v58_v15  ;;  %v67_v19 = vsub.s32 2, %v58_v15  ;;  %v71_v21 = vsub.s32 3, %v58_v15  ;;  %s454_s12 = scalar_lea.vmem %s338_s11, 256  ;;  %p459_p3 = scmp.lt.s32.totalorder %s338_s11, %s338_s11 }
  0x2e   :  { %233 = vmatprep.subr.bf16.mxu0 %v383_v9  ;;  %195 = vmatpush1.bf16.msra.mxu1 %v384_v10  ;;  %v75_v28 = vsub.s32 4, %v58_v15  ;;  %v79_v31 = vsub.s32 5, %v58_v15  ;;  %p455_p2 = scmp.ne.s32.totalorder %s338_s11, %s454_s12  ;;  %p460_p4 = scmp.lt.s32.totalorder %s454_s12, %s454_s12 }
  0x2f   :  { %v60_v20 = vrot.slane %v55_v17, %v59_v16  ;;  %v64_v22 = vrot.slane %v55_v17, %v63_v18  ;;  %v68_v24 = vrot.slane %v55_v17, %v67_v19  ;;  %v72_v27 = vrot.slane %v55_v17, %v71_v21 }
  0x30   :  { %359 = vmatmul.mubr.msk.bf16.vlgmr.msra.gmra.mrb[0].mxu0 %vm147_vm0, %v42_v8  ;;  %v76_v39 = vrot.slane %v55_v17, %v75_v28  ;;  %v80_v41 = vrot.slane %v55_v17, %v79_v31  ;;  %p461_p5 = por %p460_p4, %p459_p3 }
  0x31   :  { %234 = vmatpush1.bf16.msra.mxu0 %v381_v11  ;;  %265 = vmatprep.mubr.bf16.mxu0 %v486_v0 }
  0x32   :  { %235 = vmatprep.subr.bf16.mxu0 %v387_v12  ;;  %360 = vmatmul.mubr.msk.bf16.vlgmr.msra.gmra.mrb[0].mxu1 %vm147_vm0, %v42_v8  ;;  %p462_p6 = pnand %p461_p5, %p455_p2 }
  0x35   :  { %236 = vmatpush1.bf16.msra.mxu0 %v385_v13 }
  0x38   :  { %361 = vmatmul.mubr.msk.bf16.vlgmr.msra.gmra.mrb[4].mxu0 %vm147_vm0, %v42_v8 }
 0x103   :  { %v185_v23 = vpop.f32.mrb[0].mxu0 }
 0x104   :  { %v186_v25 = vadd.f32 %v185_v23, %v60_v20  ;;  %v187_v26 = vpop.f32.mrb[1].mxu0 }
 0x105   :  { %v188_v29 = vadd.f32 %v187_v26, %v64_v22  ;;  %v189_v30 = vpop.f32.mrb[2].mxu0  ;;  %v226_v33 = vpop.f32.mrb[0].mxu1 }
 0x106   :  { %v190_v32 = vpop.f32.mrb[3].mxu0  ;;  %v227_v34 = vadd.f32 %v226_v33, %v68_v24  ;;  %v228_v35 = vpop.f32.mrb[1].mxu1 }
 0x107   :  { %v274_v36 = vmax.f32 %v186_v25, %v188_v29  ;;  %v229_v37 = vadd.f32 %v228_v35, %v72_v27  ;;  %v230_v38 = vpop.f32.mrb[2].mxu1 }
 0x108   :  { %v231_v40 = vpop.f32.mrb[3].mxu1 }
 0x109   :  { %275 = vmax.xlane.f32.xlu0 %v274_v36  ;;  %v289_v42 = vmax.f32 %v227_v34, %v229_v37 }
 0x10b   :  { %v267_v43 = vpop.f32.mrb[4].mxu0 }
 0x10c   :  { %v268_v44 = vadd.f32 %v267_v43, %v76_v39  ;;  %v269_v45 = vpop.f32.mrb[5].mxu0 }
 0x10d   :  { %v270_v46 = vadd.f32 %v269_v45, %v80_v41  ;;  %v271_v47 = vpop.f32.mrb[6].mxu0  ;;  %290 = vmax.xlane.f32.xlu0 %v289_v42 }
 0x10e   :  { %v272_v48 = vpop.f32.mrb[7].mxu0 }
 0x10f   :  { %v306_v49 = vmax.f32 %v268_v44, %v270_v46 }
 0x111   :  { %307 = vmax.xlane.f32.xlu1 %v306_v49 }
 0x196   :  { %v276_v50 = vpop.xlane.xlu0 %275 }
 0x197   :  { %v277_v51 = vsub.f32 %v186_v25, %v276_v50  ;;  %v278_v52 = vsub.f32 %v188_v29, %v276_v50 }
 0x199   :  { %v279_v53 = vmul.f32 1.442695, %v277_v51  ;;  %v281_v54 = vmul.f32 1.442695, %v278_v52 }
 0x19a   :  { %v291_v55 = vpop.xlane.xlu0 %290 }
 0x19b   :  { %388 = vpow2.f32 %v279_v53  ;;  %v292_v56 = vsub.f32 %v227_v34, %v291_v55  ;;  %v293_v57 = vsub.f32 %v229_v37, %v291_v55 }
 0x19c   :  { %390 = vpow2.f32 %v281_v54 }
 0x19d   :  { %v294_v58 = vmul.f32 1.442695, %v292_v56  ;;  %v296_v59 = vmul.f32 1.442695, %v293_v57 }
 0x19e   :  { %v308_v60 = vpop.xlane.xlu1 %307 }
 0x19f   :  { %392 = vpow2.f32 %v294_v58  ;;  %v309_v61 = vsub.f32 %v268_v44, %v308_v60  ;;  %v310_v62 = vsub.f32 %v270_v46, %v308_v60 }
 0x1a0   :  { %394 = vpow2.f32 %v296_v59 }
 0x1a1   :  { %v311_v63 = vmul.f32 1.442695, %v309_v61  ;;  %v313_v0 = vmul.f32 1.442695, %v310_v62 }
 0x1a3   :  { %396 = vpow2.f32 %v311_v63 }
 0x1a4   :  { %398 = vpow2.f32 %v313_v0 }
 0x1a5   :  { %v389_v1 = vpop.eup %388 }
 0x1a6   :  { %v391_v2 = vpop.eup %390 }
 0x1a7   :  { %v283_v3 = vadd.f32 %v391_v2, %v389_v1 }
 0x1a9   :  { %v393_v4 = vpop.eup %392  ;;  %284 = vadd.xlane.f32.xlu1 %v283_v3 }
 0x1aa   :  { %v395_v5 = vpop.eup %394 }
 0x1ab   :  { %v298_v6 = vadd.f32 %v395_v5, %v393_v4 }
 0x1ad   :  { %v397_v7 = vpop.eup %396  ;;  %299 = vadd.xlane.f32.xlu0 %v298_v6 }
 0x1ae   :  { %v399_v8 = vpop.eup %398 }
 0x1af   :  { %v315_v9 = vadd.f32 %v399_v8, %v397_v7 }
 0x1b1   :  { %316 = vadd.xlane.f32.xlu1 %v315_v9 }
 0x236   :  { %v285_v10 = vpop.xlane.xlu1 %284 }
 0x237   :  { %400 = vrcp.f32 %v285_v10 }
 0x23a   :  { %v300_v11 = vpop.xlane.xlu0 %299 }
 0x23b   :  { %402 = vrcp.f32 %v300_v11 }
 0x23e   :  { %v317_v12 = vpop.xlane.xlu1 %316 }
 0x23f   :  { %404 = vrcp.f32 %v317_v12 }
 0x241   :  { %v401_v13 = vpop.eup %400 }
 0x242   :  { %v287_v17 = vmul.f32 %v401_v13, %v389_v1  ;;  %v288_v18 = vmul.f32 %v401_v13, %v391_v2 }
 0x245   :  { %v403_v14 = vpop.eup %402 }
 0x246   :  { %v302_v15 = vmul.f32 %v403_v14, %v393_v4  ;;  %v303_v16 = vmul.f32 %v403_v14, %v395_v5 }
 0x248   :  { %v304_v22 = vadd.f32 %v302_v15, %v287_v17  ;;  %v305_v23 = vadd.f32 %v303_v16, %v288_v18 }
 0x249   :  { %v405_v19 = vpop.eup %404 }
 0x24a   :  { %v319_v20 = vmul.f32 %v405_v19, %v397_v7  ;;  %v320_v21 = vmul.f32 %v405_v19, %v399_v8 }
 0x24c   :  { %v321_v24 = vadd.f32 %v319_v20, %v304_v22  ;;  %v322_v25 = vadd.f32 %v320_v21, %v305_v23 }
 0x24e   :  { %406 = vlog2.f32 %v321_v24 }
 0x24f   :  { %408 = vlog2.f32 %v322_v25 }
 0x258   :  { %v407_v26 = vpop.eup %406 }
 0x259   :  { %v409_v27 = vpop.eup %408  ;;  %v324_v28 = vmul.f32 0.6931472, %v407_v26 }
 0x25a   :  { %v326_v29 = vmul.f32 0.6931472, %v409_v27 }
 0x25b   :  { %v362_v30 = vadd.f32 -1.0986123, %v324_v28 }
 0x25c   :  { %v363_v31 = vadd.f32 -1.0986123, %v326_v29 }
 0x25d   :  { %329 = vst [vmem:[#allocation7] sm:$0xff] %v362_v30 }
 0x25e   :  { %330 = vst [vmem:[#allocation7 + $0x8] sm:$0xff] %v363_v31 }
 0x25f   :  { %465 = shalt.err (!%p462_p6)
}
 0x260   :  { %s466_s15 = scalar_lea.hbm %s557_s3, 256 }
 0x261   :  { %p467_p7 = scmp.ne.s32.totalorder %s557_s3, %s466_s15  ;;  %p470_p8 = scmp.lt.u32.totalorder %s466_s15, %s557_s3 }
 0x263   :  { %p472_p9 = pnand %p470_p8, %p467_p7 }
 0x265   :  { %475 = shalt.err (!%p472_p9)
}
 0x266   :  { %340 = dma.vmem_to_hbm [thread:$0]  %s338_s11, 256, %s557_s3, [#allocation4]  }
 0x267   :  { %480 = dma.done.wait [#allocation4], 256  }
 0x268   :  { %481 = vsyncadd [#allocation4], 4294967040 }
 0x269   :  { %344 = vsyncpa [#allocation3], 1 }
 0x26a   :  { %345 = vsyncpa [#allocation6], 1 }
 0x26b   :  { %346 = vsyncpa [#allocation4], 1 }

</bundles_post_ra>
